<compile_context>
chip_gen: v6e
topology: v6e:2x2x1
jax: 0.10.0
libtpu: 0.0.40
codegen_flags: <defaults>
</compile_context>

<pallas_src>
import functools

import jax
import jax.numpy as jnp
from jax import lax
from jax.experimental import pallas as pl
from jax.experimental.pallas import tpu as pltpu

BN_EPS = 1e-5


def _round_up(x, m):
    return (x + m - 1) // m * m


def _pick_tb(B):
    """Batch elements per grid step.

    Amortizes per-grid-step overhead / small DMAs, but keeps >= 2 grid steps
    when possible so the parallel axis can be split across both v7x TCs.
    """
    best = 1
    for tb in range(1, min(B, 8) + 1):
        if B % tb == 0 and (B // tb >= 2 or B == 1):
            best = tb
    return best


def _make_kernel(TB, C_in, C_out, K, DIL, PAD, W, W_IN_PAD, W_OUT_PAD, mxu_dtype):
    def kernel(x_ref, scale_ref, shift_ref, w_ref, bias_ref, o_ref):
        # x block: (TB, C_in, W_IN_PAD), W on the lane axis.
        x = x_ref[...].astype(jnp.float32)

        # ---- BatchNorm1d (batch stats pre-folded into scale/shift) ----
        y = x * scale_ref[...] + shift_ref[...]               # (TB, C_in, W_IN_PAD)

        # ---- SiLU: y * sigmoid(y).  exp and the approximate reciprocal both
        #      run on the EUP slot; no f32 VPU divide. ----
        act = y * pl.reciprocal(1.0 + jnp.exp(-y), approx=True)

        # The wrapper padded x with zeros, but BN+SiLU of a zero column is NOT
        # zero, so zero the pad columns with one cheap VPU select, then cast to
        # bf16 *before* any window shifting (half the relayout bytes / vregs).
        col = lax.broadcasted_iota(jnp.int32, (TB, C_in, W_IN_PAD), 2)
        valid = (col >= PAD) & (col < PAD + W)
        act = jnp.where(valid, act, 0.0).astype(mxu_dtype)    # (TB, C_in, W_IN_PAD)

        bias = bias_ref[...]                                  # (C_out, 1) f32

        # Conv as K accumulated matmuls over lane-shifted windows (no axis-0
        # im2col concatenate).  TB and K are small static ints -> unrolled.
        # TODO(synk): for large C_out (>=128) swap operands so the constant
        # weight is the stationary MXU operand and W_out streams.
        for b in range(TB):
            a_b = act[b]                                      # (C_in, W_IN_PAD) bf16
            acc = jnp.zeros((C_out, W_OUT_PAD), jnp.float32)
            for t in range(K):
                # Pure lane shift of the bf16 activation (XLU), start offset
                # t*DIL; W_OUT_PAD is a multiple of 128 so the matmul streams
                # full lanes and the store below is lane-dense.
                win = a_b[:, t * DIL: t * DIL + W_OUT_PAD]    # (C_in, W_OUT_PAD)
                acc += jnp.dot(w_ref[t], win,
                               preferred_element_type=jnp.float32)
            o_ref[b] = (acc + bias).astype(o_ref.dtype)       # lane-dense store

    return kernel


def bn_swish_conv(x, bn_gamma, bn_beta, conv_weight, log_weight_norm, conv_bias,
                  *, kernel_size, stride=1, padding=0, dilation=1,
                  mxu_dtype=jnp.bfloat16):
    """x: (B, C_in, W) float32, PyTorch NCW layout. Returns (B, C_out, W_out)."""
    assert stride == 1, "stride>1 / upsample (stride==-1) not implemented"  # TODO(synk)
    B, C_in, W = x.shape
    C_out = conv_weight.shape[0]
    K = kernel_size
    DIL = dilation
    W_out = (W + 2 * padding - DIL * (K - 1) - 1) // stride + 1

    # --- BN batch statistics (training mode, biased var) in ONE pass over x:
    #     E[x] and E[x^2] fuse into a single HBM read in XLA. ---
    x32 = x.astype(jnp.float32)
    g32 = bn_gamma.astype(jnp.float32)
    m = jnp.mean(x32, axis=(0, 2))                                   # (C_in,)
    m2 = jnp.mean(x32 * x32, axis=(0, 2))                            # (C_in,)
    var = jnp.maximum(m2 - m * m, 0.0)
    inv = lax.rsqrt(var + BN_EPS)
    scale = (g32 * inv).reshape(1, C_in, 1)
    shift = (bn_beta.astype(jnp.float32) - g32 * m * inv).reshape(1, C_in, 1)

    # --- weight normalization (parameter setup, plain JAX glue) ---
    n = jnp.exp(log_weight_norm.astype(jnp.float32))                  # (C_out,1,1)
    w32 = conv_weight.astype(jnp.float32)
    wn = jnp.sqrt(jnp.sum(jnp.square(w32), axis=(1, 2)))              # (C_out,)
    w_norm = n * w32 / (wn.reshape(-1, 1, 1) + 1e-5)                  # (C_out,C_in,K)

    # Per-tap weights (K, C_out, C_in), bf16 for the MXU.
    w_taps = jnp.transpose(w_norm, (2, 0, 1)).astype(mxu_dtype)
    bias = conv_bias.reshape(C_out, 1).astype(jnp.float32)

    # --- lane-dense output block + wrapper-side zero padding along W ---
    W_out_pad = _round_up(W_out, 128)            # lane-dense output stores
    W_in_pad = DIL * (K - 1) + W_out_pad         # every tap window stays in-bounds
    x_pad = jnp.pad(x32, ((0, 0), (0, 0), (padding, W_in_pad - W - padding)))

    TB = _pick_tb(B)
    grid = (B // TB,)

    kernel = _make_kernel(TB, C_in, C_out, K, DIL, padding, W,
                          W_in_pad, W_out_pad, mxu_dtype)

    out_full = pl.pallas_call(
        kernel,
        out_shape=jax.ShapeDtypeStruct((B, C_out, W_out_pad), jnp.float32),
        grid=grid,
        in_specs=[
            pl.BlockSpec((TB, C_in, W_in_pad), lambda g: (g, 0, 0)),   # x (NCW, padded)
            pl.BlockSpec((1, C_in, 1), lambda g: (0, 0, 0)),           # BN scale
            pl.BlockSpec((1, C_in, 1), lambda g: (0, 0, 0)),           # BN shift
            pl.BlockSpec((K, C_out, C_in), lambda g: (0, 0, 0)),       # per-tap weights
            pl.BlockSpec((C_out, 1), lambda g: (0, 0)),                # conv bias
        ],
        out_specs=pl.BlockSpec((TB, C_out, W_out_pad), lambda g: (g, 0, 0)),
        compiler_params=pltpu.CompilerParams(
            dimension_semantics=("parallel",),   # megacore split on v7x
            # 32 MiB is ample here and safe on all generations; for large W
            # tiles raise toward 64-100 MiB on v5e/v6e (128 MiB VMEM), cap
            # around ~48 MiB on v7x (64 MiB VMEM).
            vmem_limit_bytes=32 * 1024 * 1024),
        # NOTE: the constant-index operands (scale/shift/weights/bias) could be
        # single-buffered (pipeline_mode) to save VMEM for very large weights.
    )(x_pad, scale, shift, w_taps, bias)

    return out_full[:, :, :W_out]


def _reference(x, bn_gamma, bn_beta, conv_weight, log_weight_norm, conv_bias,
               *, kernel_size, stride=1, padding=0, dilation=1):
    """Pure-JAX reference mirroring the PyTorch forward (training-mode BN + SiLU)."""
    mean = jnp.mean(x, axis=(0, 2), keepdims=True)
    var = jnp.mean(jnp.square(x - mean), axis=(0, 2), keepdims=True)
    xhat = (x - mean) / jnp.sqrt(var + BN_EPS)
    y = bn_gamma.reshape(1, -1, 1) * xhat + bn_beta.reshape(1, -1, 1)
    act = y * jax.nn.sigmoid(y)                                        # SiLU / Swish

    n = jnp.exp(log_weight_norm)
    wn = jnp.sqrt(jnp.sum(conv_weight * conv_weight, axis=(1, 2)))
    w_norm = n * conv_weight / (wn.reshape(-1, 1, 1) + 1e-5)

    out = lax.conv_general_dilated(
        act, w_norm,
        window_strides=(stride,),
        padding=[(padding, padding)],
        rhs_dilation=(dilation,),
        dimension_numbers=("NCH", "OIH", "NCH"))
    return out + conv_bias.reshape(1, -1, 1)


if __name__ == "__main__":
    # Small shapes consistent with the module's forward: (B, C_in, W).
    B, C_in, C_out, W = 2, 4, 8, 16
    kernel_size, stride, padding, dilation = 3, 1, 1, 1

    key = jax.random.PRNGKey(0)
    kx, kw, kb = jax.random.split(key, 3)

    x = jax.random.normal(kx, (B, C_in, W), dtype=jnp.float32)

    # BatchNorm1d default init: weight=1, bias=0.
    bn_gamma = jnp.ones((C_in,), jnp.float32)
    bn_beta = jnp.zeros((C_in,), jnp.float32)

    # Conv1D params (deterministic synthetic init; shapes as in __init__).
    conv_weight = 0.1 * jax.random.normal(kw, (C_out, C_in, kernel_size),
                                          dtype=jnp.float32)
    init_norm = jnp.sqrt(jnp.sum(conv_weight * conv_weight, axis=(1, 2)))
    log_weight_norm = jnp.log(init_norm + 0.01).reshape(-1, 1, 1)       # (C_out,1,1)
    conv_bias = 0.05 * jax.random.normal(kb, (C_out,), dtype=jnp.float32)

    run = functools.partial(bn_swish_conv, kernel_size=kernel_size, stride=stride,
                            padding=padding, dilation=dilation)
    out = jax.jit(run)(x, bn_gamma, bn_beta, conv_weight, log_weight_norm,
                       conv_bias)
    out = jax.block_until_ready(out)

    ref = _reference(x, bn_gamma, bn_beta, conv_weight, log_weight_norm,
                     conv_bias, kernel_size=kernel_size, stride=stride,
                     padding=padding, dilation=dilation)

    W_out = (W + 2 * padding - dilation * (kernel_size - 1) - 1) // stride + 1
    assert out.shape == ref.shape == (B, C_out, W_out), out.shape
    # Tolerance covers the bf16 MXU inputs + approx reciprocal (f32 reference);
    # real semantic bugs (wrong activation / indexing) would give O(0.1..1) errors.
    assert jnp.allclose(out, ref, atol=3e-2, rtol=3e-2), \
        f"max abs err = {jnp.max(jnp.abs(out - ref))}"

    print("KERNEL_OK")
</pallas_src>

<mosaic_0001>
module attributes {stable_mosaic.version = 11 : i64} {
  func.func @kernel(%arg0: i32, %arg1: memref<1x4x130xf32, #tpu.memory_space<vmem>>, %arg2: memref<1x4x1xf32, #tpu.memory_space<vmem>>, %arg3: memref<1x4x1xf32, #tpu.memory_space<vmem>>, %arg4: memref<3x8x4xbf16, #tpu.memory_space<vmem>>, %arg5: memref<8x1xf32, #tpu.memory_space<vmem>>, %arg6: memref<1x8x128xf32, #tpu.memory_space<vmem>>) attributes {dimension_semantics = [#tpu.dimension_semantics<parallel>], iteration_bounds = array<i64: 2>, scalar_prefetch = 0 : i64, scratch_operands = 0 : i64, tpu.core_type = #tpu.core_type<tc>, window_params = [{transform_indices = @transform_0, window_bounds = array<i64: 1, 4, 130>}, {pipeline_mode = #tpu.pipeline_mode<synchronous>, transform_indices = @transform_1, window_bounds = array<i64: 1, 4, 1>}, {pipeline_mode = #tpu.pipeline_mode<synchronous>, transform_indices = @transform_2, window_bounds = array<i64: 1, 4, 1>}, {pipeline_mode = #tpu.pipeline_mode<synchronous>, transform_indices = @transform_3, window_bounds = array<i64: 3, 8, 4>}, {pipeline_mode = #tpu.pipeline_mode<synchronous>, transform_indices = @transform_4, window_bounds = array<i64: 8, 1>}, {transform_indices = @transform_5, window_bounds = array<i64: 1, 8, 128>}]} {
    %c0 = arith.constant 0 : index
    %c0_0 = arith.constant 0 : index
    %c0_1 = arith.constant 0 : index
    %0 = vector.load %arg1[%c0, %c0_0, %c0_1] : memref<1x4x130xf32, #tpu.memory_space<vmem>>, vector<1x4x130xf32>
    %c0_2 = arith.constant 0 : index
    %c0_3 = arith.constant 0 : index
    %c0_4 = arith.constant 0 : index
    %1 = vector.load %arg2[%c0_2, %c0_3, %c0_4] : memref<1x4x1xf32, #tpu.memory_space<vmem>>, vector<1x4x1xf32>
    %2 = vector.broadcast %1 : vector<1x4x1xf32> to vector<1x4x130xf32>
    %3 = arith.mulf %0, %2 : vector<1x4x130xf32>
    %c0_5 = arith.constant 0 : index
    %c0_6 = arith.constant 0 : index
    %c0_7 = arith.constant 0 : index
    %4 = vector.load %arg3[%c0_5, %c0_6, %c0_7] : memref<1x4x1xf32, #tpu.memory_space<vmem>>, vector<1x4x1xf32>
    %5 = vector.broadcast %4 : vector<1x4x1xf32> to vector<1x4x130xf32>
    %6 = arith.addf %3, %5 : vector<1x4x130xf32>
    %cst = arith.constant 0.000000e+00 : f32
    %7 = vector.broadcast %cst : f32 to vector<1x4x130xf32>
    %8 = arith.subf %7, %6 : vector<1x4x130xf32>
    %9 = math.exp %8 : vector<1x4x130xf32>
    %cst_8 = arith.constant 1.000000e+00 : f32
    %10 = vector.broadcast %cst_8 : f32 to vector<1x4x130xf32>
    %11 = arith.addf %10, %9 : vector<1x4x130xf32>
    %12 = tpu.reciprocal %11 {approx = true} : vector<1x4x130xf32> -> vector<1x4x130xf32>
    %13 = arith.mulf %6, %12 : vector<1x4x130xf32>
    %14 = tpu.iota {dimensions = array<i32: 2>} : vector<1x4x130xi32>
    %c1_i32 = arith.constant 1 : i32
    %15 = vector.broadcast %c1_i32 : i32 to vector<1x4x130xi32>
    %16 = arith.cmpi sge, %14, %15 : vector<1x4x130xi32>
    %c17_i32 = arith.constant 17 : i32
    %17 = vector.broadcast %c17_i32 : i32 to vector<1x4x130xi32>
    %18 = arith.cmpi slt, %14, %17 : vector<1x4x130xi32>
    %19 = arith.andi %16, %18 : vector<1x4x130xi1>
    %cst_9 = arith.constant 0.000000e+00 : f32
    %20 = vector.broadcast %cst_9 : f32 to vector<1x4x130xf32>
    %21 = arith.select %19, %13, %20 : vector<1x4x130xi1>, vector<1x4x130xf32>
    %22 = arith.truncf %21 : vector<1x4x130xf32> to vector<1x4x130xbf16>
    %c0_10 = arith.constant 0 : index
    %c0_11 = arith.constant 0 : index
    %23 = vector.load %arg5[%c0_10, %c0_11] : memref<8x1xf32, #tpu.memory_space<vmem>>, vector<8x1xf32>
    %24 = vector.shape_cast %22 : vector<1x4x130xbf16> to vector<4x130xbf16>
    %cst_12 = arith.constant 0.000000e+00 : f32
    %25 = vector.broadcast %cst_12 : f32 to vector<8x128xf32>
    %26 = vector.extract_strided_slice %24 {offsets = [0, 0], sizes = [4, 128], strides = [1, 1]} : vector<4x130xbf16> to vector<4x128xbf16>
    %c0_13 = arith.constant 0 : index
    %c0_14 = arith.constant 0 : index
    %c0_15 = arith.constant 0 : index
    %27 = vector.load %arg4[%c0_13, %c0_14, %c0_15] : memref<3x8x4xbf16, #tpu.memory_space<vmem>>, vector<1x8x4xbf16>
    %28 = vector.shape_cast %27 : vector<1x8x4xbf16> to vector<8x4xbf16>
    %cst_16 = arith.constant dense<0.000000e+00> : vector<8x128xf32>
    %29 = tpu.matmul %28, %26, %cst_16 {dimension_numbers = #tpu.dot_dimension_numbers<[1], [0], [0], [1], [0, 0, 1, 1], [], []>} : vector<8x4xbf16>, vector<4x128xbf16>, vector<8x128xf32> -> vector<8x128xf32>
    %30 = arith.addf %25, %29 : vector<8x128xf32>
    %31 = vector.extract_strided_slice %24 {offsets = [0, 1], sizes = [4, 128], strides = [1, 1]} : vector<4x130xbf16> to vector<4x128xbf16>
    %c1 = arith.constant 1 : index
    %c0_17 = arith.constant 0 : index
    %c0_18 = arith.constant 0 : index
    %32 = vector.load %arg4[%c1, %c0_17, %c0_18] : memref<3x8x4xbf16, #tpu.memory_space<vmem>>, vector<1x8x4xbf16>
    %33 = vector.shape_cast %32 : vector<1x8x4xbf16> to vector<8x4xbf16>
    %cst_19 = arith.constant dense<0.000000e+00> : vector<8x128xf32>
    %34 = tpu.matmul %33, %31, %cst_19 {dimension_numbers = #tpu.dot_dimension_numbers<[1], [0], [0], [1], [0, 0, 1, 1], [], []>} : vector<8x4xbf16>, vector<4x128xbf16>, vector<8x128xf32> -> vector<8x128xf32>
    %35 = arith.addf %30, %34 : vector<8x128xf32>
    %36 = vector.extract_strided_slice %24 {offsets = [0, 2], sizes = [4, 128], strides = [1, 1]} : vector<4x130xbf16> to vector<4x128xbf16>
    %c2 = arith.constant 2 : index
    %c0_20 = arith.constant 0 : index
    %c0_21 = arith.constant 0 : index
    %37 = vector.load %arg4[%c2, %c0_20, %c0_21] : memref<3x8x4xbf16, #tpu.memory_space<vmem>>, vector<1x8x4xbf16>
    %38 = vector.shape_cast %37 : vector<1x8x4xbf16> to vector<8x4xbf16>
    %cst_22 = arith.constant dense<0.000000e+00> : vector<8x128xf32>
    %39 = tpu.matmul %38, %36, %cst_22 {dimension_numbers = #tpu.dot_dimension_numbers<[1], [0], [0], [1], [0, 0, 1, 1], [], []>} : vector<8x4xbf16>, vector<4x128xbf16>, vector<8x128xf32> -> vector<8x128xf32>
    %40 = arith.addf %35, %39 : vector<8x128xf32>
    %41 = vector.broadcast %23 : vector<8x1xf32> to vector<8x128xf32>
    %42 = arith.addf %40, %41 : vector<8x128xf32>
    %c0_23 = arith.constant 0 : index
    %c0_24 = arith.constant 0 : index
    %c0_25 = arith.constant 0 : index
    %43 = vector.load %arg6[%c0_23, %c0_24, %c0_25] : memref<1x8x128xf32, #tpu.memory_space<vmem>>, vector<1x8x128xf32>
    %44 = vector.shape_cast %43 : vector<1x8x128xf32> to vector<8x128xf32>
    %45 = vector.shape_cast %42 : vector<8x128xf32> to vector<1x8x128xf32>
    tpu.vector_store %arg6[%c0_23, %c0_24, %c0_25], %45 {strides = array<i32>} : memref<1x8x128xf32, #tpu.memory_space<vmem>>, vector<1x8x128xf32>,
    return
  }
  func.func @transform_0(%arg0: i32) -> (i32, i32, i32) {
    %c0_i32 = arith.constant 0 : i32
    %c0_i32_0 = arith.constant 0 : i32
    %c0_i32_1 = arith.constant 0 : i32
    return %arg0, %c0_i32, %c0_i32_0 : i32, i32, i32
  }
  func.func @transform_1(%arg0: i32) -> (i32, i32, i32) {
    %c0_i32 = arith.constant 0 : i32
    %c0_i32_0 = arith.constant 0 : i32
    %c0_i32_1 = arith.constant 0 : i32
    %c0_i32_2 = arith.constant 0 : i32
    return %c0_i32, %c0_i32_0, %c0_i32_1 : i32, i32, i32
  }
  func.func @transform_2(%arg0: i32) -> (i32, i32, i32) {
    %c0_i32 = arith.constant 0 : i32
    %c0_i32_0 = arith.constant 0 : i32
    %c0_i32_1 = arith.constant 0 : i32
    %c0_i32_2 = arith.constant 0 : i32
    return %c0_i32, %c0_i32_0, %c0_i32_1 : i32, i32, i32
  }
  func.func @transform_3(%arg0: i32) -> (i32, i32, i32) {
    %c0_i32 = arith.constant 0 : i32
    %c0_i32_0 = arith.constant 0 : i32
    %c0_i32_1 = arith.constant 0 : i32
    %c0_i32_2 = arith.constant 0 : i32
    return %c0_i32, %c0_i32_0, %c0_i32_1 : i32, i32, i32
  }
  func.func @transform_4(%arg0: i32) -> (i32, i32) {
    %c0_i32 = arith.constant 0 : i32
    %c0_i32_0 = arith.constant 0 : i32
    %c0_i32_1 = arith.constant 0 : i32
    return %c0_i32, %c0_i32_0 : i32, i32
  }
  func.func @transform_5(%arg0: i32) -> (i32, i32, i32) {
    %c0_i32 = arith.constant 0 : i32
    %c0_i32_0 = arith.constant 0 : i32
    %c0_i32_1 = arith.constant 0 : i32
    return %arg0, %c0_i32, %c0_i32_0 : i32, i32, i32
  }
}

</mosaic_0001>

<bundles_post_ra>
// kernel: bn_swish_conv.1
= control target key start
LH: loop header
LB: loop body
LE: loop exit
PB: predicated region body
PF: predicated region fallthrough
CT: control target
= control target key end

     0   :  { %10 = vsyncpa [#allocation3], 0  ;;  %s840_s0 = inlined_call_operand.vmem [shape: f32[2,4,130], index: 0, kind: input, shape index: {}]   ;;  %s841_s1 = inlined_call_operand.vmem [shape: f32[1,4,1], index: 1, kind: input, shape index: {}]   ;;  %s842_s2 = inlined_call_operand.vmem [shape: f32[1,4,1], index: 2, kind: input, shape index: {}]   ;;  %s843_s3 = inlined_call_operand.vmem [shape: bf16[3,8,4], index: 3, kind: input, shape index: {}]   ;;  %s844_s4 = inlined_call_operand.vmem [shape: f32[8,1], index: 4, kind: input, shape index: {}]   ;;  %s845_s5 = inlined_call_operand.hbm [shape: f32[2,8,128], index: 5, kind: output, shape index: {}]  }
   0x1   :  { %12 = vsyncpa [#allocation3 + $0x1], 0  ;;  %s708_s18 = smov 0   ;;  %s710_s19 = smov 0  }
   0x2   :  { %s712_s20 = smov 0   ;;  %s714_s21 = smov 0  }
   0x3 LB: > { %s729_s22 = sadd.s32 4294967295, %s668_s21   ;;  %s516_s23 = sadd.s32 4294967294, %s668_s21   ;;  %s668_s21 = sphi %s714_s21, %s851_s21   ;;  %s664_s20 = sphi %s712_s20, %s850_s20   ;;  %s660_s19 = sphi %s710_s19, %s849_s19   ;;  %s656_s18 = sphi %s708_s18, %s848_s18  }
   0x4   : > { %s733_s24 = sadd.s32 1, %s668_s21   ;;  %s135_s25 = sadd.s32 1, %s664_s20 }
   0x5   : > { %s132_s26 = ssub.s32 %s668_s21, %s733_s24  ;;  %p145_p0 = scmp.ne.s32.totalorder %s664_s20, %s660_s19 }
   0x6   : > { %p133_p1 = scmp.eq.s32.totalorder %s132_s26, 0  ;;  %p146_p2 = scmp.eq.s32.totalorder %s729_s22, 1 }
   0x7   : > { %p151_p3 = scmp.ne.s32.totalorder %s660_s19, %s656_s18  ;;  %p152_p4 = scmp.eq.s32.totalorder %s516_s23, 1 }
   0x8   : > { %s744_s27 = scalar_select %p133_p1, %s664_s20, %s135_s25  }
   0x9   : > { %p746_p5 = por %p146_p2, %p145_p0  ;;  %p750_p6 = por %p152_p4, %p151_p3 }
   0xa   : > { %p519_p7 = scmp.ge.s32.totalorder %s668_s21, 1  ;;  %p190_p8 = scmp.lt.s32.totalorder %s668_s21, 3 }
   0xc   : > { %p191_p9 = pnand %p519_p7, %p190_p8 }
   0xd   : > { %p218_p10 = scmp.lt.s32.totalorder (!%p191_p9), %s729_s22, 1  ;;  %s674_s14 = smov (!%p191_p9), 126  }
   0xe   : > { %194 = sbr.rel (%p191_p9) target bundleno = 535 (0x217), region = 40  ;;  %s675_s15 = smov (!%p191_p9), 127  }
   0xf   : > { %s215_s8 = sand.u32 (!%p191_p9), 1, %s660_s19   ;;  %s677_s17 = smov (!%p191_p9), [#allocation2]  }
  0x10   : > { %s612_s23 = sshll.u32 (!%p191_p9), %s677_s17, 4  ;;  %s613_s23 = int_to_ptr.vmem [resolvable:$false] %s612_s23 }
  0x11   : > { %s614_s25 = scalar_lea.vmem (!%p191_p9), %s613_s23, 256 }
  0x13   : > { %v225_v0 = vld [vmem:[%s841_s1] sm:$0xf]  ;;  %v670_v1 = vmov 0   ;;  %v671_v3 = vmov 0.0   ;;  %v672_v4 = vmov 839922192   ;;  %v233_v6 = vlaneseq }
  0x14   : > { %603 = vset.pattern.permute.xlu0 %v670_v1  ;;  %v239_v2 = vld [vmem:[%s842_s2] sm:$0xf]  ;;  %545 = vmatprep.subr.bf16.mxu1 %v671_v3  ;;  %v231_v5 = vunpack.c.l.s4 %v672_v4  ;;  %s219_s9 = scalar_select %p218_p10, %s729_s22, 1  ;;  %vm673_vm3 = vmmov 0   ;;  %vm291_vm4 = vcmask 1041408   ;;  %vm287_vm5 = vcmask 31744  }
  0x15   : > { %228 = vperm.xlu0 %603, %v225_v0   ;;  %539 = vmatprep.subr.bf16.mxu0 %v671_v3  ;;  %v234_v8 = vshrl.u32 %v233_v6, 7  ;;  %v260_v21 = vand.u32 127, %v233_v6  ;;  %v275_v27 = vld [vmem:[%s844_s4] sm:$0xff]  ;;  %v676_v29 = vmov 0.0|0.0   ;;  %vm285_vm6 = vcmask 1039360  }
  0x16   : > { %v232_v7 = vunpack.c.0.s8 %v231_v5  ;;  %s532_s10 = sshll.u32 %s219_s9, 3  ;;  %541 = vmatprep.mubr.msk.bf16.mxu0 %vm673_vm3, %v671_v3  ;;  %547 = vmatprep.mubr.msk.bf16.mxu1 %vm673_vm3, %v671_v3  ;;  %v276_v28 = vld [vmem:[%s843_s3] sm:$0xf]  ;;  %vm387_vm7 = vcmask 1031168   ;;  %v523_v34 = vld [vmem:[%s843_s3 + $0x4] sm:$0xf] }
  0x17   : > { %s222_s13 = scalar_lea.vmem %s840_s0, %s532_s10  ;;  %vm262_vm0 = vcmp.ge.s32.totalorder %v260_v21, 1  ;;  %vm264_vm1 = vcmp.lt.s32.totalorder %v260_v21, 17  ;;  %v526_v39 = vld [vmem:[%s843_s3 + $0x8] sm:$0xf]  ;;  %s520_s9 = sshll.u32 %s215_s8, 3 }
  0x18   : > { %v235_v9 = vsub.s32 %v232_v7, %v234_v8  ;;  %v224_v12 = vld [vmem:[%s222_s13] sm:$0xff]  ;;  %vm266_vm2 = vmand %vm262_vm0, %vm264_vm1  ;;  %s529_s10 = sshll.u32 %s729_s22, 7  ;;  %s217_s11 = scalar_lea.vmem [#allocation2], %s520_s9 }
  0x19   : > { %242 = vperm.xlu0 %603, %v239_v2   ;;  %s457_s12 = sshll.u32 %s217_s11, 4  ;;  %s444_s22 = scalar_lea.sflag [#allocation3], %s215_s8  ;;  %s801_s12 = int_to_ptr.vmem [resolvable:$true] %s457_s12 }
  0x1a   : > { %s608_s16 = scalar_lea.vmem %s801_s12, 128  ;;  %p615_p0 = scmp.lt.s32.totalorder %s801_s12, %s613_s23 }
  0x1b   : > { %p609_p11 = scmp.ne.s32.totalorder %s801_s12, %s608_s16  ;;  %p616_p1 = scmp.lt.s32.totalorder %s614_s25, %s608_s16 }
  0x1d   : > { %p610_p12 = pnand %p609_p11, %p746_p5  ;;  %p617_p2 = por %p616_p1, %p615_p0 }
  0x1f   : > { %p611_p13 = pneg %p610_p12 }
  0x21   : > { %p618_p3 = pnand %p617_p2, %p611_p13 }
  0x90   : > { %v229_v10 = vpop.permute.xlu0 %228 }
  0x91   : > { %v236_v11 = vrot.slane %v229_v10, %v235_v9 }
  0x93   : > { %v238_v14 = vmul.f32 %v236_v11, %v224_v12 }
  0x94   : > { %v243_v13 = vpop.permute.xlu0 %242 }
  0x95   : > { %v250_v15 = vrot.slane %v243_v13, %v235_v9 }
  0x97   : > { %v252_v16 = vadd.f32 %v250_v15, %v238_v14 }
  0x99   : > { %v253_v17 = vsub.f32 0.0, %v252_v16 }
  0x9b   : > { %v254_v18 = vmul.f32 1.442695, %v253_v17 }
  0x9d   : > { %604 = vpow2.f32 %v254_v18 }
  0xaa   : > { %v605_v19 = vpop.eup %604 }
  0xab   : > { %v256_v20 = vadd.f32 1.0, %v605_v19 }
  0xad   : > { %606 = vrcp.f32 %v256_v20 }
  0xba   : > { %v607_v22 = vpop.eup %606 }
  0xbb   : > { %v258_v23 = vmul.f32 %v607_v22, %v252_v16 }
  0xbd   : > { %v271_v24 = vsel %vm266_vm2, %v258_v23, 0.0 }
  0xbe   : > { %v273_v25 = vpack.c.bf16 %v271_v24, %v271_v24 }
  0xc0   : > { %383 = vrot.lane.b32.xlu0 %v273_v25, %s674_s14  ;;  %281 = vrot.lane.b32.xlu1 %v273_v25, %s675_s15  ;;  %v339_v26 = vsel %vm291_vm4, %v273_v25, 0 }
  0xc1   : > { %546 = vmatpush3.bf16.msra.mxu1 %v339_v26 }
  0xc4   : > { %438 = vperm.xlu0 %603, %v275_v27   ;;  %283 = vrot.lane.b32.xlu1 %v676_v29, %s675_s15  ;;  %s799_s15 = scalar_lea.hbm %s845_s5, %s529_s10 }
  0xc5   : > { %548 = vmatmul.mubr.msk.bf16.vlgmr.msra.gmra.mxu1 %vm287_vm5, %v276_v28 }
  0xc8   : > { %385 = vrot.lane.b32.xlu1 %v676_v29, %s674_s14 }
 0x132   : > { %v282_v30 = vpop.permute.xlu1 %281  ;;  %v384_v35 = vpop.permute.xlu0 %383 }
 0x136   : > { %v284_v31 = vpop.permute.xlu1 %283 }
 0x137   : > { %v286_v32 = vsel %vm285_vm6, %v282_v30, %v284_v31 }
 0x138   : > { %v293_v33 = vsel %vm291_vm4, %v286_v32, 0 }
 0x139   : > { %540 = vmatpush3.bf16.msra.mxu0 %v293_v33 }
 0x13a   : > { %v386_v36 = vpop.permute.xlu1 %385  ;;  %551 = vmatprep.subr.bf16.mxu0 %v671_v3 }
 0x13b   : > { %v388_v37 = vsel %vm387_vm7, %v384_v35, %v386_v36 }
 0x13c   : > { %v393_v38 = vsel %vm291_vm4, %v388_v37, 0  ;;  %542 = vmatmul.mubr.msk.bf16.vlgmr.msra.gmra.mxu0 %vm287_vm5, %v523_v34 }
 0x13d   : > { %552 = vmatpush3.bf16.msra.mxu0 %v393_v38  ;;  %553 = vmatprep.mubr.msk.bf16.mxu0 %vm673_vm3, %v671_v3 }
 0x13f   : > { %v439_v51 = vpop.permute.xlu0 %438 }
 0x144   : > { %554 = vmatmul.mubr.msk.bf16.vlgmr.msra.gmra.mxu0 %vm287_vm5, %v526_v39 }
 0x185   : > { %v375_v40 = vpop.f32.mrf.mxu1 }
 0x187   : > { %v549_v41 = vpop.f32.mrf.mxu1 }
 0x189   : > { %v378_v42 = vpop.f32.mrf.mxu1 }
 0x18b   : > { %v550_v43 = vpop.f32.mrf.mxu1 }
 0x1fc   : > { %v329_v44 = vpop.f32.mrf.mxu0 }
 0x1fd   : > { %v376_v48 = vadd.f32 %v375_v40, %v329_v44 }
 0x1fe   : > { %v543_v45 = vpop.f32.mrf.mxu0 }
 0x200   : > { %v332_v46 = vpop.f32.mrf.mxu0 }
 0x202   : > { %v544_v47 = vpop.f32.mrf.mxu0 }
 0x204   : > { %v429_v49 = vpop.f32.mrf.mxu0 }
 0x205   : > { %v435_v50 = vadd.f32 %v429_v49, %v376_v48 }
 0x206   : > { %v555_v52 = vpop.f32.mrf.mxu0 }
 0x207   : > { %v441_v53 = vadd.f32 %v439_v51, %v435_v50 }
 0x208   : > { %v432_v54 = vpop.f32.mrf.mxu0 }
 0x209   : > { %442 = vst [vmem:[%s217_s11] sm:$0xff] %v441_v53 }
 0x20a   : > { %v556_v55 = vpop.f32.mrf.mxu0 }
 0x20b   : > { %621 = shalt.err (!%p618_p3)
}
 0x20c   : > { %s622_s26 = scalar_lea.hbm %s799_s15, 128  ;;  %s626_s7 = scalar_lea.hbm %s845_s5, 256 }
 0x20d   : > { %p623_p4 = scmp.ne.s32.totalorder %s799_s15, %s622_s26  ;;  %p627_p9 = scmp.lt.s32.totalorder %s799_s15, %s845_s5 }
 0x20e   : > { %p628_p10 = scmp.lt.s32.totalorder %s626_s7, %s622_s26 }
 0x20f   : > { %p624_p7 = pnand %p623_p4, %p746_p5 }
 0x210   : > { %p629_p11 = por %p628_p10, %p627_p9 }
 0x211   : > { %p625_p8 = pneg %p624_p7 }
 0x213   : > { %p630_p12 = pnand %p629_p11, %p625_p8 }
 0x215   : > { %633 = shalt.err (!%p630_p12)
}
 0x216   : > { %557 = dma.vmem_to_hbm [thread:$0]  (%p746_p5), %s801_s12, 128, %s799_s15, %s444_s22  }
 0x217 PF: > { %p563_p13 = scmp.ge.s32.totalorder %s668_s21, 2  ;;  %s469_s10 = sand.u32 1, %s656_s18  }
 0x218   : > { %s470_s11 = scalar_lea.sflag [#allocation3], %s469_s10 }
 0x219   : > { %p560_p0 = pnand %p563_p13, %p750_p6 }
 0x21b   : > { %p561_p1 = pneg %p560_p0 }
 0x21d   : > { %651 = dma.done.wait (%p561_p1), %s470_s11, 128  }
 0x21e   : > { %653 = vsyncadd (%p561_p1), %s470_s11, 4294967168  ;;  %p15_p2 = scmp.ge.s32.totalorder %s733_s24, 4   ;;  %s848_s18 = smov %s660_s19 }
 0x21f   : > { %s849_s19 = smov %s664_s20  ;;  %s850_s20 = smov %s744_s27 }
 0x220   : > { %s851_s21 = smov %s733_s24  ;;  %17 = sbr.rel (!%p15_p2) target bundleno = 3 (0x3), region = 77 }
 0x225   :  { %475 = vsyncpa [#allocation3], 1 }
 0x226   :  { %477 = vsyncpa [#allocation3 + $0x1], 1 }

</bundles_post_ra>
